<compile_context>
chip_gen: v6e
topology: v6e:2x2x1
jax: 0.10.0
libtpu: 0.0.40
codegen_flags: <defaults>
</compile_context>

<pallas_src>
import functools

import numpy as np
import jax
import jax.numpy as jnp
from jax.experimental import pallas as pl
from jax.experimental.pallas import tpu as pltpu


def _as_pair(v):
    return v if isinstance(v, tuple) else (v, v)


def _selection_weights(num_positions, basis_dim, temperature):
    """softmax((position_bias * basis_offset)/T) over patch positions.

    Input-independent: the per-patch variance broadcasts over the softmax axis in the
    reference and cancels exactly, so these constants ARE the pooling weights.
    """
    pos = np.linspace(0.0, 1.0, num_positions, dtype=np.float64)
    offs = np.linspace(-0.5, 0.5, basis_dim, dtype=np.float64)
    scores = (offs[:, None] * pos[None, :]) / float(temperature)      # (K, P)
    scores -= scores.max(axis=1, keepdims=True)
    e = np.exp(scores)
    return e / e.sum(axis=1, keepdims=True)                           # (K, P)


def _selection_matrix(kh, kw, oh, ow, basis_dim, temperature):
    """Structured matrix S (kh*ow*kw, K*ow): a patch-row @ S performs the (ky,kx)
    de-interleave and all K weighted sums in one contraction."""
    w = _selection_weights(kh * kw, basis_dim, temperature)
    D = kh * ow * kw
    S = np.zeros((D, basis_dim * ow), dtype=np.float32)
    ox = np.arange(ow)
    for k in range(basis_dim):
        for ky in range(kh):
            for kx in range(kw):
                S[ky * ow * kw + ox * kw + kx, k * ow + ox] = w[k, ky * kw + kx]
    return S


def _pick_tiles(n_bc, oh, bytes_per_oy, target_bytes=4 * 1024 * 1024):
    """Pick (bc_t, oh_t): exact divisors, ~target_bytes of input per grid step,
    >= 2 grid steps when possible (keeps both v7x TensorCores busy)."""
    bytes_per_bc = oh * bytes_per_oy
    if bytes_per_bc <= target_bytes:
        divs = [d for d in range(1, n_bc + 1) if n_bc % d == 0]
        fitting = [d for d in divs if d * bytes_per_bc <= target_bytes]
        bc_t = max(fitting)
        if bc_t == n_bc and n_bc > 1:            # keep >= 2 grid steps for v7x megacore
            bc_t = max(d for d in fitting if d < n_bc)
        return bc_t, oh
    # A single (b, c) image group already exceeds the target: split the oh axis instead.
    oh_divs = [d for d in range(1, oh + 1) if oh % d == 0 and (d % 8 == 0 or d == oh)]
    fitting = [d for d in oh_divs if d * bytes_per_oy <= target_bytes]
    oh_t = max(fitting) if fitting else min(oh_divs)
    return 1, oh_t


def basis_pooling(x, kernel_size=2, stride=None, basis_dim=2, temperature=0.1):
    """BasisPooling forward: x (B, C, H, W) -> (B, C*basis_dim, oh, ow)."""
    kh, kw = _as_pair(kernel_size)
    sh, sw = _as_pair(stride if stride is not None else (kh, kw))
    B, C, H, W = x.shape
    oh = (H - kh) // sh + 1
    ow = (W - kw) // sw + 1
    K = basis_dim
    D = kh * ow * kw                     # patch-row length, layout (ky, ox, kx)
    n_bc = B * C

    # TODO(synk): for a learnable / traced temperature, build S with jnp from the traced
    # scalar (S is already a kernel operand), instead of numpy.
    S = jnp.asarray(_selection_matrix(kh, kw, oh, ow, K, float(temperature)))

    if (sh, sw) == (kh, kw):
        # Non-overlapping pooling: im2col is a pure (copy-free) reshape; the kernel reads
        # x straight from HBM with no intermediate patches array.
        Hc, Wcrop = oh * kh, ow * kw
        xc = x if (H == Hc and W == Wcrop) else x[:, :, :Hc, :Wcrop]
        x3 = xc.reshape(n_bc, oh, D)     # rows (b,c,oy); cols (ky, ox, kx) — contiguous
    else:
        # General (overlapping/gapped) stride: one gather pass to the same layout.
        cols = [x[:, :, ky::sh, kx::sw][:, :, :oh, :ow]
                for ky in range(kh) for kx in range(kw)]
        g = jnp.stack(cols, axis=2).reshape(B, C, kh, kw, oh, ow)
        x3 = g.transpose(0, 1, 4, 2, 5, 3).reshape(n_bc, oh, D)

    bc_t, oh_t = _pick_tiles(n_bc, oh, D * x.dtype.itemsize)
    grid = (n_bc // bc_t, oh // oh_t)

    def kernel(x_ref, s_ref, o_ref):
        # (bc_t, oh_t, D) -> (bc_t*oh_t, D): leading-dim merge, lane layout unchanged.
        xb = x_ref[...].astype(jnp.float32).reshape(bc_t * oh_t, D)
        # One structured matmul does the (ky,kx) de-interleave + all K weighted sums.
        y = jnp.dot(xb, s_ref[...], preferred_element_type=jnp.float32)  # (bc_t*oh_t, K*ow)
        for k in range(K):
            yk = y[:, k * ow:(k + 1) * ow].reshape(bc_t, oh_t, ow)
            o_ref[:, k, :, :] = yk.astype(o_ref.dtype)

    out = pl.pallas_call(
        kernel,
        grid=grid,
        in_specs=[pl.BlockSpec((bc_t, oh_t, D), lambda i, j: (i, j, 0)),
                  pl.BlockSpec((D, K * ow), lambda i, j: (0, 0))],
        out_specs=pl.BlockSpec((bc_t, K, oh_t, ow), lambda i, j: (i, 0, j, 0)),
        out_shape=jax.ShapeDtypeStruct((n_bc, K, oh, ow), x.dtype),
        compiler_params=pltpu.CompilerParams(
            dimension_semantics=("parallel", "parallel"),
            vmem_limit_bytes=32 * 1024 * 1024),
    )(x3, S)

    # (B*C, K, oh, ow) -> (B, C*K, oh, ow): copy-free channel interleave (c*K + k).
    return out.reshape(B, C * K, oh, ow)


def basis_pooling_reference(x, kernel_size=2, stride=None, basis_dim=2, temperature=0.1):
    """Pure-JAX mirror of the PyTorch forward (full mean/var/softmax path) for validation."""
    kh, kw = _as_pair(kernel_size)
    sh, sw = _as_pair(stride if stride is not None else (kh, kw))
    B, C, H, W = x.shape
    oh = (H - kh) // sh + 1
    ow = (W - kw) // sw + 1
    P = kh * kw
    cols = [x[:, :, ky::sh, kx::sw][:, :, :oh, :ow]
            for ky in range(kh) for kx in range(kw)]
    patches = jnp.stack(cols, axis=2).reshape(B, C, P, oh * ow)            # (B, C, P, L)
    mean = patches.mean(axis=2, keepdims=True)
    var = ((patches - mean) ** 2).mean(axis=2, keepdims=True)              # (B, C, 1, L)
    scores = var[:, :, None, :, :]                                         # (B, C, 1, 1, L)
    pos = jnp.linspace(0.0, 1.0, P).reshape(1, 1, 1, P, 1)
    offs = jnp.linspace(-0.5, 0.5, basis_dim).reshape(1, 1, basis_dim, 1, 1)
    scores = scores + pos * offs                                           # (B, C, K, P, L)
    w = jax.nn.softmax(scores / temperature, axis=3)
    basis = jnp.sum(patches[:, :, None, :, :] * w, axis=3)                 # (B, C, K, L)
    return basis.reshape(B, C * basis_dim, oh, ow)


if __name__ == "__main__":
    key = jax.random.PRNGKey(0)
    x = jax.random.normal(key, (2, 4, 16, 16), jnp.float32)

    fn = jax.jit(functools.partial(basis_pooling, kernel_size=2, stride=2,
                                   basis_dim=2, temperature=0.1))
    out = fn(x)
    jax.block_until_ready(out)
    assert out.shape == (2, 8, 8, 8) and out.dtype == jnp.float32

    ref = basis_pooling_reference(x, 2, 2, 2, 0.1)
    max_err = float(jnp.max(jnp.abs(out - ref)))
    mean_err = float(jnp.mean(jnp.abs(out - ref)))
    # MXU f32 matmuls may run as bf16 passes at default precision -> small rounding diffs;
    # indexing/weight bugs would produce O(0.1..1) errors, so this still validates.
    assert max_err < 5e-2 and mean_err < 5e-3, f"mismatch: max={max_err}, mean={mean_err}"
    print("KERNEL_OK")
</pallas_src>

<mosaic_0001>
module attributes {stable_mosaic.version = 11 : i64} {
  func.func @kernel(%arg0: i32, %arg1: i32, %arg2: memref<4x8x32xf32, #tpu.memory_space<vmem>>, %arg3: memref<32x16xf32, #tpu.memory_space<vmem>>, %arg4: memref<4x2x8x8xf32, #tpu.memory_space<vmem>>) attributes {dimension_semantics = [#tpu.dimension_semantics<parallel>, #tpu.dimension_semantics<parallel>], iteration_bounds = array<i64: 2, 1>, scalar_prefetch = 0 : i64, scratch_operands = 0 : i64, tpu.core_type = #tpu.core_type<tc>, window_params = [{transform_indices = @transform_0, window_bounds = array<i64: 4, 8, 32>}, {pipeline_mode = #tpu.pipeline_mode<synchronous>, transform_indices = @transform_1, window_bounds = array<i64: 32, 16>}, {transform_indices = @transform_2, window_bounds = array<i64: 4, 2, 8, 8>}]} {
    %c0 = arith.constant 0 : index
    %c0_0 = arith.constant 0 : index
    %c0_1 = arith.constant 0 : index
    %0 = vector.load %arg2[%c0, %c0_0, %c0_1] : memref<4x8x32xf32, #tpu.memory_space<vmem>>, vector<4x8x32xf32>
    %1 = vector.shape_cast %0 : vector<4x8x32xf32> to vector<32x32xf32>
    %c0_2 = arith.constant 0 : index
    %c0_3 = arith.constant 0 : index
    %2 = vector.load %arg3[%c0_2, %c0_3] : memref<32x16xf32, #tpu.memory_space<vmem>>, vector<32x16xf32>
    %cst = arith.constant dense<0.000000e+00> : vector<32x16xf32>
    %3 = tpu.matmul %1, %2, %cst {dimension_numbers = #tpu.dot_dimension_numbers<[1], [0], [0], [1], [0, 0, 1, 1], [], []>} : vector<32x32xf32>, vector<32x16xf32>, vector<32x16xf32> -> vector<32x16xf32>
    %4 = vector.extract_strided_slice %3 {offsets = [0, 0], sizes = [32, 8], strides = [1, 1]} : vector<32x16xf32> to vector<32x8xf32>
    %5 = vector.shape_cast %4 : vector<32x8xf32> to vector<4x8x8xf32>
    %c0_4 = arith.constant 0 : index
    %c0_5 = arith.constant 0 : index
    %c0_6 = arith.constant 0 : index
    %c0_7 = arith.constant 0 : index
    %6 = vector.load %arg4[%c0_4, %c0_5, %c0_6, %c0_7] : memref<4x2x8x8xf32, #tpu.memory_space<vmem>>, vector<4x1x8x8xf32>
    %7 = vector.shape_cast %6 : vector<4x1x8x8xf32> to vector<4x8x8xf32>
    %8 = vector.shape_cast %5 : vector<4x8x8xf32> to vector<4x1x8x8xf32>
    tpu.vector_store %arg4[%c0_4, %c0_5, %c0_6, %c0_7], %8 {strides = array<i32>} : memref<4x2x8x8xf32, #tpu.memory_space<vmem>>, vector<4x1x8x8xf32>,
    %9 = vector.extract_strided_slice %3 {offsets = [0, 8], sizes = [32, 8], strides = [1, 1]} : vector<32x16xf32> to vector<32x8xf32>
    %10 = vector.shape_cast %9 : vector<32x8xf32> to vector<4x8x8xf32>
    %c0_8 = arith.constant 0 : index
    %c1 = arith.constant 1 : index
    %c0_9 = arith.constant 0 : index
    %c0_10 = arith.constant 0 : index
    %11 = vector.load %arg4[%c0_8, %c1, %c0_9, %c0_10] : memref<4x2x8x8xf32, #tpu.memory_space<vmem>>, vector<4x1x8x8xf32>
    %12 = vector.shape_cast %11 : vector<4x1x8x8xf32> to vector<4x8x8xf32>
    %13 = vector.shape_cast %10 : vector<4x8x8xf32> to vector<4x1x8x8xf32>
    tpu.vector_store %arg4[%c0_8, %c1, %c0_9, %c0_10], %13 {strides = array<i32>} : memref<4x2x8x8xf32, #tpu.memory_space<vmem>>, vector<4x1x8x8xf32>,
    return
  }
  func.func @transform_0(%arg0: i32, %arg1: i32) -> (i32, i32, i32) {
    %c0_i32 = arith.constant 0 : i32
    %c0_i32_0 = arith.constant 0 : i32
    return %arg0, %arg1, %c0_i32 : i32, i32, i32
  }
  func.func @transform_1(%arg0: i32, %arg1: i32) -> (i32, i32) {
    %c0_i32 = arith.constant 0 : i32
    %c0_i32_0 = arith.constant 0 : i32
    %c0_i32_1 = arith.constant 0 : i32
    return %c0_i32, %c0_i32_0 : i32, i32
  }
  func.func @transform_2(%arg0: i32, %arg1: i32) -> (i32, i32, i32, i32) {
    %c0_i32 = arith.constant 0 : i32
    %c0_i32_0 = arith.constant 0 : i32
    %c0_i32_1 = arith.constant 0 : i32
    return %arg0, %c0_i32, %arg1, %c0_i32_0 : i32, i32, i32, i32
  }
}

</mosaic_0001>

<bundles_post_ra>
// kernel: basis_pooling.1
= control target key start
LH: loop header
LB: loop body
LE: loop exit
PB: predicated region body
PF: predicated region fallthrough
CT: control target
= control target key end

     0   :  { %7 = vsyncpa [#allocation3], 0  ;;  %s735_s0 = inlined_call_operand.vmem [shape: f32[8,8,32], index: 0, kind: input, shape index: {}]   ;;  %s736_s1 = inlined_call_operand.vmem [shape: f32[32,16], index: 1, kind: input, shape index: {}]   ;;  %s737_s2 = inlined_call_operand.hbm [shape: f32[8,2,8,8], index: 2, kind: output, shape index: {}]  }
   0x1   :  { %9 = vsyncpa [#allocation3 + $0x1], 0  ;;  %s602_s9 = smov 0   ;;  %s604_s10 = smov 0  }
   0x2   :  { %s606_s11 = smov 0   ;;  %s608_s12 = smov 0  }
   0x3   :  { %s610_s13 = smov 0   ;;  %s612_s14 = smov 0  }
   0x4 LB: > { %s393_s15 = sadd.s32 4294967295, %s581_s14   ;;  %s394_s16 = sadd.s32 4294967294, %s581_s14   ;;  %s581_s14 = sphi %s612_s14, %s15_s14   ;;  %s577_s13 = sphi %s610_s13, %s744_s13   ;;  %s573_s12 = sphi %s608_s12, %s743_s12   ;;  %s569_s11 = sphi %s606_s11, %s742_s11   ;;  %s565_s10 = sphi %s604_s10, %s741_s10   ;;  %s561_s9 = sphi %s602_s9, %s740_s9  }
   0x5   : > { %s27_s17 = sadd.s32 1, %s577_s13  ;;  %s85_s18 = sadd.s32 1, %s569_s11 }
   0x6   : > { %p29_p0 = scmp.ge.s32.totalorder %s27_s17, 2  ;;  %p95_p1 = scmp.ne.s32.totalorder %s569_s11, %s565_s10 }
   0x7   : > { %p96_p2 = scmp.eq.s32.totalorder %s393_s15, 1  ;;  %p101_p3 = scmp.ne.s32.totalorder %s565_s10, %s561_s9 }
   0x8   : > { %s746_s17 = smov (%p29_p0, %s27_s17), 0  ;;  %p102_p5 = scmp.eq.s32.totalorder %s394_s16, 1 }
   0x9   : > { %p642_p4 = por %p96_p2, %p95_p1  ;;  %s80_s20 = ssub.s32 %s577_s13, %s746_s17 }
   0xa   : > { %p397_p6 = scmp.ge.s32.totalorder %s581_s14, 1  ;;  %p83_p7 = scmp.eq.s32.totalorder %s80_s20, 0 }
   0xb   : > { %p649_p8 = por %p102_p5, %p101_p3  ;;  %p135_p9 = scmp.lt.s32.totalorder %s581_s14, 3 }
   0xc   : > { %s655_s22 = scalar_select %p83_p7, %s569_s11, %s85_s18  }
   0xd   : > { %p136_p10 = pnand %p397_p6, %p135_p9 }
   0xe   : > { %s399_s27 = sshll.u32 (!%p136_p10), %s573_s12, 2  ;;  %s157_s8 = sand.u32 (!%p136_p10), 1, %s565_s10  }
   0xf   : > { %139 = sbr.rel (%p136_p10) target bundleno = 358 (0x166), region = 28  ;;  %p161_p11 = scmp.lt.s32.totalorder (!%p136_p10), %s399_s27, 7 }
  0x10   : > { %s398_s15 = sshll.u32 (!%p136_p10), %s157_s8, 6  ;;  %s583_s18 = smov (!%p136_p10), 120  }
  0x11   : > { %s159_s16 = scalar_lea.vmem (!%p136_p10), [#allocation2], %s398_s15  ;;  %s416_s20 = sshll.u32 (!%p136_p10), %s573_s12, 10 }
  0x12   : > { %s318_s23 = sshll.u32 (!%p136_p10), %s159_s16, 4  ;;  %s684_s26 = scalar_lea.hbm (!%p136_p10), %s737_s2, %s416_s20  ;;  %s686_s23 = int_to_ptr.vmem [resolvable:$true] %s318_s23 }
  0x13   : > { %s690_s12 = scalar_lea.sflag (!%p136_p10), [#allocation3], %s157_s8  ;;  %s584_s28 = smov (!%p136_p10), [#allocation2]  }
  0x14   : > { %v177_v0 = vld [vmem:[%s736_s1 + $0x18] sm:$0xff]  ;;  %v176_v1 = vld [vmem:[%s736_s1 + $0x10] sm:$0xff]  ;;  %v175_v2 = vld [vmem:[%s736_s1 + $0x8] sm:$0xff]  ;;  %s748_s27 = smov (!%p161_p11, %s399_s27), 7  ;;  %vm178_vm0 = vcmask 261120   ;;  %vm276_vm1 = vcmask 64512  }
  0x15   : > { %425 = vmatprep.subr.mxu0 %v177_v0  ;;  %439 = vmatprep.subr.mxu1 %v177_v0  ;;  %v174_v3 = vld [vmem:[%s736_s1] sm:$0xff]  ;;  %s400_s4 = sshll.u32 %s748_s27, 3  ;;  %s505_s27 = scalar_lea.vmem %s686_s23, 1024 }
  0x16   : > { %426 = vmatpush3.msra.mxu0 %v177_v0  ;;  %443 = vmatpush3.msra.mxu1 %v177_v0  ;;  %s167_s7 = scalar_lea.vmem %s735_s0, %s400_s4  ;;  %p506_p12 = scmp.ne.s32.totalorder %s686_s23, %s505_s27 }
  0x17   : > { %427 = vmatprep.subr.mxu0 %v176_v1  ;;  %440 = vmatprep.subr.mxu1 %v176_v1  ;;  %v170_v4 = vld [vmem:[%s167_s7] sm:$0xff]  ;;  %v172_v5 = vld [vmem:[%s167_s7 + $0x10] sm:$0xff]  ;;  %v171_v6 = vld [vmem:[%s167_s7 + $0x8] sm:$0xff]  ;;  %s509_s29 = sshll.u32 %s584_s28, 4  ;;  %s510_s29 = int_to_ptr.vmem [resolvable:$false] %s509_s29 }
  0x18   : > { %428 = vmatpush3.msra.mxu0 %v176_v1  ;;  %444 = vmatpush3.msra.mxu1 %v176_v1  ;;  %v173_v7 = vld [vmem:[%s167_s7 + $0x18] sm:$0xff]  ;;  %p507_p13 = pnand %p506_p12, %p642_p4  ;;  %s511_s30 = scalar_lea.vmem %s510_s29, 2048 }
  0x19   : > { %429 = vmatprep.subr.mxu0 %v175_v2  ;;  %441 = vmatprep.subr.mxu1 %v175_v2  ;;  %p512_p1 = scmp.lt.s32.totalorder %s686_s23, %s510_s29  ;;  %p513_p2 = scmp.lt.s32.totalorder %s511_s30, %s505_s27 }
  0x1a   : > { %430 = vmatpush3.msra.mxu0 %v175_v2  ;;  %445 = vmatpush3.msra.mxu1 %v175_v2  ;;  %p508_p0 = pneg %p507_p13 }
  0x1b   : > { %431 = vmatprep.subr.mxu0 %v174_v3  ;;  %442 = vmatprep.subr.mxu1 %v174_v3  ;;  %p514_p3 = por %p513_p2, %p512_p1 }
  0x1c   : > { %432 = vmatpush3.msra.mxu0 %v174_v3  ;;  %446 = vmatpush3.msra.mxu1 %v174_v3 }
  0x1d   : > { %433 = vmatprep.mubr.msk.f32.mxu0 %vm178_vm0, %v170_v4  ;;  %436 = vmatprep.mubr.msk.f32.mxu1 %vm178_vm0, %v172_v5  ;;  %p515_p5 = pnand %p514_p3, %p508_p0 }
  0x1e   : > { %434 = vmatmul.mubr.msk.f32.vlgmr.msra.gmra.mxu0 %vm178_vm0, %v171_v6  ;;  %437 = vmatmul.mubr.msk.f32.vlgmr.msra.gmra.mxu1 %vm178_vm0, %v173_v7 }
  0xde   : > { %v435_v8 = vpop.f32.mrf.mxu0  ;;  %v438_v9 = vpop.f32.mrf.mxu1 }
  0xdf   : > { %278 = vst.msk [vmem:[%s159_s16 + $0x10] sm:$0xff] %vm276_vm1, %v435_v8  ;;  %280 = vst.msk [vmem:[%s159_s16 + $0x30] sm:$0xff] %vm276_vm1, %v438_v9 }
  0xe0   : > { %v257_v10 = vpop.f32.mrf.mxu0  ;;  %v267_v11 = vpop.f32.mrf.mxu1 }
  0xe1   : > { %277 = vst.msk [vmem:[%s159_s16] sm:$0xff] %vm276_vm1, %v257_v10  ;;  %279 = vst.msk [vmem:[%s159_s16 + $0x20] sm:$0xff] %vm276_vm1, %v267_v11  ;;  %289 = vrot.lane.b32.xlu1 %v267_v11, %s583_s18  ;;  %285 = vrot.lane.b32.xlu0 %v257_v10, %s583_s18 }
  0xe5   : > { %291 = vrot.lane.b32.xlu1 %v438_v9, %s583_s18  ;;  %287 = vrot.lane.b32.xlu0 %v435_v8, %s583_s18 }
 0x153   : > { %v290_v12 = vpop.permute.xlu1 %289  ;;  %v286_v13 = vpop.permute.xlu0 %285 }
 0x154   : > { %407 = vst.msk [vmem:[%s159_s16 + $0x28] sm:$0xff] %vm276_vm1, %v290_v12  ;;  %405 = vst.msk [vmem:[%s159_s16 + $0x8] sm:$0xff] %vm276_vm1, %v286_v13 }
 0x157   : > { %v292_v14 = vpop.permute.xlu1 %291  ;;  %v288_v15 = vpop.permute.xlu0 %287 }
 0x158   : > { %408 = vst.msk [vmem:[%s159_s16 + $0x38] sm:$0xff] %vm276_vm1, %v292_v14  ;;  %406 = vst.msk [vmem:[%s159_s16 + $0x18] sm:$0xff] %vm276_vm1, %v288_v15 }
 0x159   : > { %518 = shalt.err (!%p515_p5)
}
 0x15a   : > { %s519_s3 = scalar_lea.hbm %s684_s26, 1024  ;;  %s523_s6 = scalar_lea.hbm %s737_s2, 2048 }
 0x15b   : > { %p520_p6 = scmp.ne.s32.totalorder %s684_s26, %s519_s3  ;;  %p524_p10 = scmp.lt.s32.totalorder %s684_s26, %s737_s2 }
 0x15c   : > { %p525_p11 = scmp.lt.s32.totalorder %s523_s6, %s519_s3 }
 0x15d   : > { %p521_p7 = pnand %p520_p6, %p642_p4 }
 0x15e   : > { %p526_p12 = por %p525_p11, %p524_p10 }
 0x15f   : > { %p522_p9 = pneg %p521_p7 }
 0x161   : > { %p527_p13 = pnand %p526_p12, %p522_p9 }
 0x163   : > { %530 = shalt.err (!%p527_p13)
}
 0x164   : > { %s585_s15 = smov 128   ;;  %s586_s16 = smov 8  }
 0x165   : > { %447 = dma.vmem_to_hbm [thread:$0]  (%p642_p4), %s686_s23, 1024, %s684_s26, %s690_s12, %s585_s15, %s585_s15, %s586_s16  }
 0x166 PF: > { %p453_p0 = scmp.ge.s32.totalorder %s581_s14, 2  ;;  %s333_s18 = sand.u32 1, %s561_s9  }
 0x167   : > { %s334_s20 = scalar_lea.sflag [#allocation3], %s333_s18 }
 0x168   : > { %p450_p1 = pnand %p453_p0, %p649_p8 }
 0x16a   : > { %p451_p2 = pneg %p450_p1 }
 0x16c   : > { %556 = dma.done.wait (%p451_p2), %s334_s20, 1024  }
 0x16d   : > { %558 = vsyncadd (%p451_p2), %s334_s20, 4294966272  ;;  %s15_s14 = sadd.s32 1, %s581_s14   ;;  %s740_s9 = smov %s565_s10 }
 0x16e   : > { %p12_p3 = scmp.ge.s32.totalorder %s15_s14, 4   ;;  %s741_s10 = smov %s569_s11 }
 0x16f   : > { %s742_s11 = smov %s655_s22  ;;  %s743_s12 = smov %s577_s13 }
 0x170   : > { %s744_s13 = smov %s746_s17  ;;  %14 = sbr.rel (!%p12_p3) target bundleno = 4 (0x4), region = 64 }
 0x175   :  { %339 = vsyncpa [#allocation3], 1 }
 0x176   :  { %341 = vsyncpa [#allocation3 + $0x1], 1 }

</bundles_post_ra>
